<compile_context>
chip_gen: v7x
topology: tpu7x:2x2x1
jax: 0.10.0
libtpu: 0.0.40
codegen_flags: <defaults>
</compile_context>

<pallas_src>
import jax
import jax.numpy as jnp
from jax.experimental import pallas as pl
from jax.experimental.pallas import tpu as pltpu


def mlp_kernel(z_ref,
               w1_ref, b1_ref,
               w2_ref, b2_ref,
               w3_ref, b3_ref,
               wh_ref, bh_ref,
               o_ref):
    """One batch tile.  Activations are [hidden, TB] (batch on the lane axis)."""
    f32 = jnp.float32
    cd = w2_ref.dtype  # MXU compute dtype (bf16 by default)

    # Layer 1: relu(W1 @ z^T + b1)   -> (H1, TB)   (single K=2E MXU push)
    h1 = jnp.dot(w1_ref[...], z_ref[...], preferred_element_type=f32)
    h1 = jnp.maximum(h1 + b1_ref[...], 0.0)

    # Layer 2: relu(W2 @ h1 + b2)    -> (H2, TB)
    h2 = jnp.dot(w2_ref[...], h1.astype(cd), preferred_element_type=f32)
    h2 = jnp.maximum(h2 + b2_ref[...], 0.0)

    # Layer 3: relu(W3 @ h2 + b3)    -> (H3, TB)
    h3 = jnp.dot(w3_ref[...], h2.astype(cd), preferred_element_type=f32)
    h3 = jnp.maximum(h3 + b3_ref[...], 0.0)

    # Head (out_features == 1): VPU multiply + sublane reduce, MXU stays free.
    logits = jnp.sum(h3 * wh_ref[...], axis=0, keepdims=True) + bh_ref[...]  # (1, TB)
    o_ref[0] = jax.nn.sigmoid(logits)


def _round_up(x, m):
    return ((x + m - 1) // m) * m


def pick_batch_tile(batch, max_tb=4096):
    """Largest lane-dense batch tile <= max_tb.

    If the (128-padded) batch spans more than one minimal tile, the tile is
    capped so the grid has >= 2 steps — keeps both v7x TensorCores busy via
    the parallel grid axis.  Always a multiple of 128.
    """
    b128 = _round_up(max(int(batch), 1), 128)
    tb = min(int(max_tb), b128)
    if b128 > 128 and b128 // tb < 2:
        tb = _round_up(b128 // 2, 128)
    tb = max(128, (tb // 128) * 128)
    return tb


def prepare_params(params, compute_dtype=jnp.bfloat16):
    """One-time kernel-ready param prep (hoisted out of the per-call forward).

    Weights stay in native PyTorch [out, in] layout; biases become f32 columns.
    """
    return {
        "w1": params["w1"].astype(compute_dtype),            # (H1, 2E)
        "w2": params["w2"].astype(compute_dtype),            # (H2, H1)
        "w3": params["w3"].astype(compute_dtype),            # (H3, H2)
        "b1": params["b1"].astype(jnp.float32)[:, None],     # (H1, 1)
        "b2": params["b2"].astype(jnp.float32)[:, None],     # (H2, 1)
        "b3": params["b3"].astype(jnp.float32)[:, None],     # (H3, 1)
        "wh": params["wh"].astype(jnp.float32).T,             # (H3, 1)
        "bh": params["bh"].astype(jnp.float32)[:, None],      # (1, 1)
    }


def mlp_forward(p_u, q_i, kp, *, tb=None, max_tb=4096):
    """p_u, q_i: [B, E] gathered embeddings.  kp: prepare_params() output.

    Returns [B, 1] scores (f32).
    """
    B, E = p_u.shape
    cd = kp["w1"].dtype
    H1 = kp["b1"].shape[0]
    H2 = kp["b2"].shape[0]
    H3 = kp["b3"].shape[0]

    if tb is None:
        tb = pick_batch_tile(B, max_tb)
    assert tb % 128 == 0, "batch tile must be lane-dense (multiple of 128)"

    G = pl.cdiv(B, tb)
    b_pad = G * tb
    pad = b_pad - B

    # Cast to the MXU dtype BEFORE concat/pad/transpose so the XLA relayout
    # moves half the bytes.  Batch lands on the 128-lane axis: z^T is [2E, B_pad].
    z = jnp.concatenate([p_u.astype(cd), q_i.astype(cd)], axis=1)   # [B, 2E]
    z_t = jnp.pad(z, ((0, pad), (0, 0))).T                          # [2E, B_pad]

    def resident(i):          # weights/biases: same block every grid step
        return (0, 0)

    # ---- advisory cost estimate + generation-safe VMEM budget -------------
    itemsize_cd = jnp.dtype(cd).itemsize
    w_bytes = sum(int(kp[k].size) * jnp.dtype(kp[k].dtype).itemsize for k in kp)
    stream_bytes = 2 * (2 * E) * tb * itemsize_cd      # double-buffered z^T tile
    out_bytes = 2 * tb * 4                             # double-buffered output tile
    act_bytes = (H1 + H2 + H3) * tb * 4                # f32 intermediates
    # <= 48 MiB keeps headroom on v7x's 64 MiB/TC VMEM; v5e/v6e have 128 MiB.
    vmem_limit = int(min(48 * 1024 * 1024,
                         max(32 * 1024 * 1024,
                             2 * (stream_bytes + out_bytes + act_bytes + w_bytes))))

    flops = 2 * b_pad * (2 * E * H1 + H1 * H2 + H2 * H3 + H3)
    bytes_accessed = (int(z_t.size) * itemsize_cd + w_bytes + b_pad * 4)

    out = pl.pallas_call(
        mlp_kernel,
        out_shape=jax.ShapeDtypeStruct((G, 1, tb), jnp.float32),
        grid=(G,),
        in_specs=[
            # streamed z^T tile (auto double-buffered).  If xprof ever shows
            # exposed input DMA, add pipeline_mode=pl.Buffered(3) here.
            pl.BlockSpec((2 * E, tb), lambda i: (0, i)),
            pl.BlockSpec(kp["w1"].shape, resident),
            pl.BlockSpec(kp["b1"].shape, resident),
            pl.BlockSpec(kp["w2"].shape, resident),
            pl.BlockSpec(kp["b2"].shape, resident),
            pl.BlockSpec(kp["w3"].shape, resident),
            pl.BlockSpec(kp["b3"].shape, resident),
            pl.BlockSpec(kp["wh"].shape, resident),
            pl.BlockSpec(kp["bh"].shape, resident),
        ],
        out_specs=pl.BlockSpec((1, 1, tb), lambda i: (i, 0, 0)),
        compiler_params=pltpu.CompilerParams(
            dimension_semantics=("parallel",),
            vmem_limit_bytes=vmem_limit,
        ),
        cost_estimate=pl.CostEstimate(
            flops=int(flops),
            transcendentals=int(b_pad),
            bytes_accessed=int(bytes_accessed),
        ),
    )(z_t, kp["w1"], kp["b1"], kp["w2"], kp["b2"],
      kp["w3"], kp["b3"], kp["wh"], kp["bh"])

    # (G, 1, TB) lane-dense slab -> [B, 1] scores (drop the padded rows).
    return out.reshape(b_pad)[:B].reshape(B, 1)


def init_params(key, n_user, n_item, embed_dim, hidden_dim):
    """Mirror the PyTorch _init_weight_: normal(0, 0.01) weights, zero biases.

    Weights are stored in PyTorch nn.Linear layout: weight [out, in], bias [out].
    """
    ks = jax.random.split(key, 6)
    std = 0.01
    h1, h2, h3 = hidden_dim
    return {
        "embed_u": std * jax.random.normal(ks[0], (n_user, embed_dim), jnp.float32),
        "embed_i": std * jax.random.normal(ks[1], (n_item, embed_dim), jnp.float32),
        "w1": std * jax.random.normal(ks[2], (h1, 2 * embed_dim), jnp.float32),
        "b1": jnp.zeros((h1,), jnp.float32),
        "w2": std * jax.random.normal(ks[3], (h2, h1), jnp.float32),
        "b2": jnp.zeros((h2,), jnp.float32),
        "w3": std * jax.random.normal(ks[4], (h3, h2), jnp.float32),
        "b3": jnp.zeros((h3,), jnp.float32),
        "wh": std * jax.random.normal(ks[5], (1, h3), jnp.float32),
        "bh": jnp.zeros((1,), jnp.float32),
    }


def mlp_model(user_ids, item_ids, embed_u, embed_i, kparams):
    # Embedding lookups (plain JAX glue gather).
    # TODO(synk): fuse this gather into the kernel via scalar-prefetched ids +
    # per-row async copies from tables kept in memory_space=pl.ANY.
    p_u = embed_u[user_ids]   # [B, E]
    q_i = embed_i[item_ids]   # [B, E]
    return mlp_forward(p_u, q_i, kparams)


def mlp_reference(user_ids, item_ids, params):
    """Pure-JAX f32 reference matching the PyTorch forward."""
    p_u = params["embed_u"][user_ids]
    q_i = params["embed_i"][item_ids]
    z = jnp.concatenate([p_u, q_i], axis=1)
    a1 = jax.nn.relu(z @ params["w1"].T + params["b1"])
    a2 = jax.nn.relu(a1 @ params["w2"].T + params["b2"])
    a3 = jax.nn.relu(a2 @ params["w3"].T + params["b3"])
    return jax.nn.sigmoid(a3 @ params["wh"].T + params["bh"])


if __name__ == "__main__":
    # Small config consistent with the module's forward.
    n_user, n_item = 64, 64
    embed_dim = 16
    hidden_dim = [64, 32, 16]

    key = jax.random.PRNGKey(0)
    pkey, ukey, ikey = jax.random.split(key, 3)
    params = init_params(pkey, n_user, n_item, embed_dim, hidden_dim)
    kparams = prepare_params(params)          # one-time kernel-ready prep

    fwd = jax.jit(mlp_model)

    # Case 1: tiny batch (single grid step).
    batch = 8
    user_ids = jax.random.randint(ukey, (batch,), 0, n_user)
    item_ids = jax.random.randint(ikey, (batch,), 0, n_item)
    out = jax.block_until_ready(
        fwd(user_ids, item_ids, params["embed_u"], params["embed_i"], kparams))
    assert out.shape == (batch, 1)
    ref = mlp_reference(user_ids, item_ids, params)
    assert bool(jnp.all(jnp.isfinite(out)))
    assert bool(jnp.allclose(out, ref, atol=2e-3)), "kernel mismatch vs reference (B=8)"

    # Case 2: multi-tile batch (exercises the padded / parallel-grid path).
    batch2 = 300
    u2key, i2key = jax.random.split(jax.random.PRNGKey(1))
    user_ids2 = jax.random.randint(u2key, (batch2,), 0, n_user)
    item_ids2 = jax.random.randint(i2key, (batch2,), 0, n_item)
    out2 = jax.block_until_ready(
        fwd(user_ids2, item_ids2, params["embed_u"], params["embed_i"], kparams))
    assert out2.shape == (batch2, 1)
    ref2 = mlp_reference(user_ids2, item_ids2, params)
    assert bool(jnp.all(jnp.isfinite(out2)))
    assert bool(jnp.allclose(out2, ref2, atol=2e-3)), "kernel mismatch vs reference (B=300)"

    print("KERNEL_OK")
</pallas_src>

<mosaic_0001>
module attributes {stable_mosaic.version = 11 : i64} {
  func.func @mlp_kernel(%arg0: i32, %arg1: memref<32x128xbf16, #tpu.memory_space<vmem>>, %arg2: memref<64x32xbf16, #tpu.memory_space<vmem>>, %arg3: memref<64x1xf32, #tpu.memory_space<vmem>>, %arg4: memref<32x64xbf16, #tpu.memory_space<vmem>>, %arg5: memref<32x1xf32, #tpu.memory_space<vmem>>, %arg6: memref<16x32xbf16, #tpu.memory_space<vmem>>, %arg7: memref<16x1xf32, #tpu.memory_space<vmem>>, %arg8: memref<16x1xf32, #tpu.memory_space<vmem>>, %arg9: memref<1x1xf32, #tpu.memory_space<vmem>>, %arg10: memref<1x1x128xf32, #tpu.memory_space<vmem>>) attributes {dimension_semantics = [#tpu.dimension_semantics<parallel>], iteration_bounds = array<i64: 1>, scalar_prefetch = 0 : i64, scratch_operands = 0 : i64, tpu.core_type = #tpu.core_type<tc>, window_params = [{transform_indices = @transform_0, window_bounds = array<i64: 32, 128>}, {pipeline_mode = #tpu.pipeline_mode<synchronous>, transform_indices = @transform_1, window_bounds = array<i64: 64, 32>}, {pipeline_mode = #tpu.pipeline_mode<synchronous>, transform_indices = @transform_2, window_bounds = array<i64: 64, 1>}, {pipeline_mode = #tpu.pipeline_mode<synchronous>, transform_indices = @transform_3, window_bounds = array<i64: 32, 64>}, {pipeline_mode = #tpu.pipeline_mode<synchronous>, transform_indices = @transform_4, window_bounds = array<i64: 32, 1>}, {pipeline_mode = #tpu.pipeline_mode<synchronous>, transform_indices = @transform_5, window_bounds = array<i64: 16, 32>}, {pipeline_mode = #tpu.pipeline_mode<synchronous>, transform_indices = @transform_6, window_bounds = array<i64: 16, 1>}, {pipeline_mode = #tpu.pipeline_mode<synchronous>, transform_indices = @transform_7, window_bounds = array<i64: 16, 1>}, {pipeline_mode = #tpu.pipeline_mode<synchronous>, transform_indices = @transform_8, window_bounds = array<i64: 1, 1>}, {transform_indices = @transform_9, window_bounds = array<i64: 1, 1, 128>}]} {
    %c0 = arith.constant 0 : index
    %c0_0 = arith.constant 0 : index
    %0 = vector.load %arg2[%c0, %c0_0] : memref<64x32xbf16, #tpu.memory_space<vmem>>, vector<64x32xbf16>
    %c0_1 = arith.constant 0 : index
    %c0_2 = arith.constant 0 : index
    %1 = vector.load %arg1[%c0_1, %c0_2] : memref<32x128xbf16, #tpu.memory_space<vmem>>, vector<32x128xbf16>
    %cst = arith.constant dense<0.000000e+00> : vector<64x128xf32>
    %2 = tpu.matmul %0, %1, %cst {dimension_numbers = #tpu.dot_dimension_numbers<[1], [0], [0], [1], [0, 0, 1, 1], [], []>} : vector<64x32xbf16>, vector<32x128xbf16>, vector<64x128xf32> -> vector<64x128xf32>
    %c0_3 = arith.constant 0 : index
    %c0_4 = arith.constant 0 : index
    %3 = vector.load %arg3[%c0_3, %c0_4] : memref<64x1xf32, #tpu.memory_space<vmem>>, vector<64x1xf32>
    %4 = vector.broadcast %3 : vector<64x1xf32> to vector<64x128xf32>
    %5 = arith.addf %2, %4 : vector<64x128xf32>
    %cst_5 = arith.constant 0.000000e+00 : f32
    %6 = vector.broadcast %cst_5 : f32 to vector<64x128xf32>
    %7 = arith.maximumf %5, %6 : vector<64x128xf32>
    %c0_6 = arith.constant 0 : index
    %c0_7 = arith.constant 0 : index
    %8 = vector.load %arg4[%c0_6, %c0_7] : memref<32x64xbf16, #tpu.memory_space<vmem>>, vector<32x64xbf16>
    %9 = arith.truncf %7 : vector<64x128xf32> to vector<64x128xbf16>
    %cst_8 = arith.constant dense<0.000000e+00> : vector<32x128xf32>
    %10 = tpu.matmul %8, %9, %cst_8 {dimension_numbers = #tpu.dot_dimension_numbers<[1], [0], [0], [1], [0, 0, 1, 1], [], []>} : vector<32x64xbf16>, vector<64x128xbf16>, vector<32x128xf32> -> vector<32x128xf32>
    %c0_9 = arith.constant 0 : index
    %c0_10 = arith.constant 0 : index
    %11 = vector.load %arg5[%c0_9, %c0_10] : memref<32x1xf32, #tpu.memory_space<vmem>>, vector<32x1xf32>
    %12 = vector.broadcast %11 : vector<32x1xf32> to vector<32x128xf32>
    %13 = arith.addf %10, %12 : vector<32x128xf32>
    %cst_11 = arith.constant 0.000000e+00 : f32
    %14 = vector.broadcast %cst_11 : f32 to vector<32x128xf32>
    %15 = arith.maximumf %13, %14 : vector<32x128xf32>
    %c0_12 = arith.constant 0 : index
    %c0_13 = arith.constant 0 : index
    %16 = vector.load %arg6[%c0_12, %c0_13] : memref<16x32xbf16, #tpu.memory_space<vmem>>, vector<16x32xbf16>
    %17 = arith.truncf %15 : vector<32x128xf32> to vector<32x128xbf16>
    %cst_14 = arith.constant dense<0.000000e+00> : vector<16x128xf32>
    %18 = tpu.matmul %16, %17, %cst_14 {dimension_numbers = #tpu.dot_dimension_numbers<[1], [0], [0], [1], [0, 0, 1, 1], [], []>} : vector<16x32xbf16>, vector<32x128xbf16>, vector<16x128xf32> -> vector<16x128xf32>
    %c0_15 = arith.constant 0 : index
    %c0_16 = arith.constant 0 : index
    %19 = vector.load %arg7[%c0_15, %c0_16] : memref<16x1xf32, #tpu.memory_space<vmem>>, vector<16x1xf32>
    %20 = vector.broadcast %19 : vector<16x1xf32> to vector<16x128xf32>
    %21 = arith.addf %18, %20 : vector<16x128xf32>
    %cst_17 = arith.constant 0.000000e+00 : f32
    %22 = vector.broadcast %cst_17 : f32 to vector<16x128xf32>
    %23 = arith.maximumf %21, %22 : vector<16x128xf32>
    %c0_18 = arith.constant 0 : index
    %c0_19 = arith.constant 0 : index
    %24 = vector.load %arg8[%c0_18, %c0_19] : memref<16x1xf32, #tpu.memory_space<vmem>>, vector<16x1xf32>
    %25 = vector.broadcast %24 : vector<16x1xf32> to vector<16x128xf32>
    %26 = arith.mulf %23, %25 : vector<16x128xf32>
    %cst_20 = arith.constant dense<0.000000e+00> : vector<128xf32>
    %27 = vector.multi_reduction <add>, %26, %cst_20 [0] : vector<16x128xf32> to vector<128xf32>
    %28 = vector.shape_cast %27 : vector<128xf32> to vector<1x128xf32>
    %c0_21 = arith.constant 0 : index
    %c0_22 = arith.constant 0 : index
    %29 = vector.load %arg9[%c0_21, %c0_22] : memref<1x1xf32, #tpu.memory_space<vmem>>, vector<1x1xf32>
    %30 = vector.broadcast %29 : vector<1x1xf32> to vector<1x128xf32>
    %31 = arith.addf %28, %30 : vector<1x128xf32>
    %32 = arith.negf %31 : vector<1x128xf32>
    %33 = math.exp %32 : vector<1x128xf32>
    %cst_23 = arith.constant 1.000000e+00 : f32
    %34 = vector.broadcast %cst_23 : f32 to vector<1x128xf32>
    %35 = arith.addf %34, %33 : vector<1x128xf32>
    %36 = arith.divf %34, %35 : vector<1x128xf32>
    %c0_24 = arith.constant 0 : index
    %c0_25 = arith.constant 0 : index
    %c0_26 = arith.constant 0 : index
    %37 = vector.load %arg10[%c0_24, %c0_25, %c0_26] : memref<1x1x128xf32, #tpu.memory_space<vmem>>, vector<1x1x128xf32>
    %38 = vector.shape_cast %37 : vector<1x1x128xf32> to vector<1x128xf32>
    %39 = vector.shape_cast %36 : vector<1x128xf32> to vector<1x1x128xf32>
    tpu.vector_store %arg10[%c0_24, %c0_25, %c0_26], %39 {strides = array<i32>} : memref<1x1x128xf32, #tpu.memory_space<vmem>>, vector<1x1x128xf32>,
    return
  }
  func.func @transform_0(%arg0: i32) -> (i32, i32) {
    %c0_i32 = arith.constant 0 : i32
    %c0_i32_0 = arith.constant 0 : i32
    return %c0_i32, %arg0 : i32, i32
  }
  func.func @transform_1(%arg0: i32) -> (i32, i32) {
    %c0_i32 = arith.constant 0 : i32
    %c0_i32_0 = arith.constant 0 : i32
    %c0_i32_1 = arith.constant 0 : i32
    return %c0_i32, %c0_i32_0 : i32, i32
  }
  func.func @transform_2(%arg0: i32) -> (i32, i32) {
    %c0_i32 = arith.constant 0 : i32
    %c0_i32_0 = arith.constant 0 : i32
    %c0_i32_1 = arith.constant 0 : i32
    return %c0_i32, %c0_i32_0 : i32, i32
  }
  func.func @transform_3(%arg0: i32) -> (i32, i32) {
    %c0_i32 = arith.constant 0 : i32
    %c0_i32_0 = arith.constant 0 : i32
    %c0_i32_1 = arith.constant 0 : i32
    return %c0_i32, %c0_i32_0 : i32, i32
  }
  func.func @transform_4(%arg0: i32) -> (i32, i32) {
    %c0_i32 = arith.constant 0 : i32
    %c0_i32_0 = arith.constant 0 : i32
    %c0_i32_1 = arith.constant 0 : i32
    return %c0_i32, %c0_i32_0 : i32, i32
  }
  func.func @transform_5(%arg0: i32) -> (i32, i32) {
    %c0_i32 = arith.constant 0 : i32
    %c0_i32_0 = arith.constant 0 : i32
    %c0_i32_1 = arith.constant 0 : i32
    return %c0_i32, %c0_i32_0 : i32, i32
  }
  func.func @transform_6(%arg0: i32) -> (i32, i32) {
    %c0_i32 = arith.constant 0 : i32
    %c0_i32_0 = arith.constant 0 : i32
    %c0_i32_1 = arith.constant 0 : i32
    return %c0_i32, %c0_i32_0 : i32, i32
  }
  func.func @transform_7(%arg0: i32) -> (i32, i32) {
    %c0_i32 = arith.constant 0 : i32
    %c0_i32_0 = arith.constant 0 : i32
    %c0_i32_1 = arith.constant 0 : i32
    return %c0_i32, %c0_i32_0 : i32, i32
  }
  func.func @transform_8(%arg0: i32) -> (i32, i32) {
    %c0_i32 = arith.constant 0 : i32
    %c0_i32_0 = arith.constant 0 : i32
    %c0_i32_1 = arith.constant 0 : i32
    return %c0_i32, %c0_i32_0 : i32, i32
  }
  func.func @transform_9(%arg0: i32) -> (i32, i32, i32) {
    %c0_i32 = arith.constant 0 : i32
    %c0_i32_0 = arith.constant 0 : i32
    %c0_i32_1 = arith.constant 0 : i32
    return %arg0, %c0_i32, %c0_i32_0 : i32, i32, i32
  }
}

</mosaic_0001>

<bundles_post_ra>
// kernel: mlp_model.1
= control target key start
LH: loop header
LB: loop body
LE: loop exit
PB: predicated region body
PF: predicated region fallthrough
CT: control target
= control target key end

     0   :  { %v507_v1 = vmov 0   ;;  %vm127_vm0 = vcmask 261120   ;;  %vm255_vm1 = vcmask 523264   ;;  %v508_v63 = vmov 0.0   ;;  %s648_s0 = inlined_call_operand.vmem [shape: bf16[32,128], index: 0, kind: input, shape index: {}]   ;;  %s649_s1 = inlined_call_operand.vmem [shape: bf16[64,32], index: 1, kind: input, shape index: {}]   ;;  %s650_s8 = inlined_call_operand.<no memory space> [shape: f32[1,1], index: 8, kind: input, shape index: {}]   ;;  %s651_s2 = inlined_call_operand.vmem [shape: f32[64,1], index: 2, kind: input, shape index: {}]   ;;  %s652_s4 = inlined_call_operand.vmem [shape: f32[32,1], index: 4, kind: input, shape index: {}]   ;;  %s653_s6 = inlined_call_operand.vmem [shape: f32[16,1], index: 6, kind: input, shape index: {}]   ;;  %s654_s7 = inlined_call_operand.vmem [shape: f32[16,1], index: 7, kind: input, shape index: {}]   ;;  %s655_s3 = inlined_call_operand.vmem [shape: bf16[32,64], index: 3, kind: input, shape index: {}]   ;;  %s656_s5 = inlined_call_operand.vmem [shape: bf16[16,32], index: 5, kind: input, shape index: {}]   ;;  %s657_s9 = inlined_call_operand.vmem [shape: f32[1,1,128], index: 9, kind: output, shape index: {}]  }
   0x1   :  { %v494_v0 = vld [vmem:[%s648_s0] sm:$0xff]   ;;  %492 = vset.pattern.permute.xlu0 %v507_v1  ;;  %493 = vset.pattern.permute.xlu1 %v507_v1  ;;  %v14_v2 = vstv %s650_s8  ;;  %v495_v3 = vld [vmem:[%s648_s0 + $0x8] sm:$0xff]   ;;  %v49_v7 = vld [vmem:[%s651_s2 + $0x10] sm:$0xff]  ;;  %vm509_vm2 = vmmov 0  }
   0x2   :  { %15 = vst [vmem:[#allocation2] sm:$0x1] %v14_v2  ;;  %457 = vmatprep.subr.bf16.mxu0 %v494_v0  ;;  %v496_v4 = vld [vmem:[%s649_s1] sm:$0xff]   ;;  %v497_v5 = vld [vmem:[%s649_s1 + $0x8] sm:$0xff]   ;;  %v498_v8 = vld [vmem:[%s649_s1 + $0x10] sm:$0xff]   ;;  %67 = vperm.xlu1 %493, %v49_v7  }
   0x3   :  { %458 = vmatpush3.bf16.msra.mxu0 %v494_v0  ;;  %461 = vmatprep.mubr.msk.bf16.mxu0 %vm127_vm0, %v496_v4  ;;  %v47_v6 = vld [vmem:[%s651_s2] sm:$0xff]  ;;  %v48_v9 = vld [vmem:[%s651_s2 + $0x8] sm:$0xff]  ;;  %v50_v10 = vld [vmem:[%s651_s2 + $0x18] sm:$0xff] }
   0x4   :  { %459 = vmatprep.subr.bf16.mxu0 %v495_v3  ;;  %57 = vperm.xlu0 %492, %v47_v6   ;;  %v51_v11 = vld [vmem:[%s651_s2 + $0x20] sm:$0xff]  ;;  %v52_v12 = vld [vmem:[%s651_s2 + $0x28] sm:$0xff]  ;;  %v499_v13 = vld [vmem:[%s649_s1 + $0x18] sm:$0xff]  }
   0x5   :  { %v53_v14 = vld [vmem:[%s651_s2 + $0x30] sm:$0xff]  ;;  %v54_v15 = vld [vmem:[%s651_s2 + $0x38] sm:$0xff]  ;;  %v221_v16 = vld [vmem:[%s652_s4] sm:$0xff] }
   0x6   :  { %72 = vperm.xlu1 %493, %v50_v10   ;;  %v222_v17 = vld [vmem:[%s652_s4 + $0x8] sm:$0xff]  ;;  %v223_v18 = vld [vmem:[%s652_s4 + $0x10] sm:$0xff]  ;;  %v224_v19 = vld [vmem:[%s652_s4 + $0x18] sm:$0xff] }
   0x7   :  { %460 = vmatpush3.bf16.msra.mxu0 %v495_v3  ;;  %v319_v20 = vld [vmem:[%s653_s6] sm:$0xff]  ;;  %v320_v21 = vld [vmem:[%s653_s6 + $0x8] sm:$0xff] }
   0x8   :  { %62 = vperm.xlu0 %492, %v48_v9   ;;  %v382_v22 = vld [vmem:[%s654_s7] sm:$0xff]  ;;  %v383_v23 = vld [vmem:[%s654_s7 + $0x8] sm:$0xff]  ;;  %481 = vmatprep.subr.bf16.mxu0 %v508_v63 }
   0x9   :  { %v403_v24 = vld [vmem:[#allocation2] sm:$0x1]  ;;  %v501_v62 = vld [vmem:[%s655_s3 + $0x8] sm:$0xff]  }
   0xa   :  { %462 = vmatmul.mubr.msk.bf16.vlgmr.msra.gmra.mrb[0].mxu0 %vm127_vm0, %v497_v5  ;;  %82 = vperm.xlu1 %493, %v52_v12   ;;  %v500_v25 = vld [vmem:[%s655_s3] sm:$0xff]  }
   0xb   :  { %465 = vmatprep.mubr.msk.bf16.mxu0 %vm127_vm0, %v498_v8  ;;  %477 = vmatprep.mubr.msk.bf16.mxu1 %vm255_vm1, %v500_v25 }
   0xc   :  { %77 = vperm.xlu0 %492, %v51_v11  }
   0xe   :  { %92 = vperm.xlu1 %493, %v54_v15  }
  0x10   :  { %87 = vperm.xlu0 %492, %v53_v14  }
  0x12   :  { %466 = vmatmul.mubr.msk.bf16.gmra.mrb[4].mxu0 %vm127_vm0, %v499_v13  ;;  %232 = vperm.xlu1 %493, %v222_v17  }
  0x13   :  { %485 = vmatprep.mubr.msk.bf16.mxu0 %vm509_vm2, %v508_v63 }
  0x14   :  { %227 = vperm.xlu0 %492, %v221_v16  }
  0x16   :  { %242 = vperm.xlu1 %493, %v224_v19  }
  0x18   :  { %237 = vperm.xlu0 %492, %v223_v18   ;;  %v502_v18 = vld [vmem:[%s656_s5] sm:$0xff]  }
  0x1a   :  { %328 = vperm.xlu1 %493, %v320_v21  }
  0x1c   :  { %323 = vperm.xlu0 %492, %v319_v20  }
  0x1e   :  { %391 = vperm.xlu1 %493, %v383_v23  }
  0x20   :  { %386 = vperm.xlu0 %492, %v382_v22  }
  0x24   :  { %406 = vperm.xlu0 %492, %v403_v24  }
  0x81   :  { %v68_v27 = vpop.permute.xlu1 %67 }
  0x83   :  { %v58_v26 = vpop.permute.xlu0 %57 }
  0x85   :  { %v73_v29 = vpop.permute.xlu1 %72 }
  0x87   :  { %v63_v28 = vpop.permute.xlu0 %62 }
  0x89   :  { %v83_v38 = vpop.permute.xlu1 %82 }
  0x8b   :  { %v78_v33 = vpop.permute.xlu0 %77 }
  0x8d   :  { %v93_v50 = vpop.permute.xlu1 %92 }
  0x8f   :  { %v88_v45 = vpop.permute.xlu0 %87 }
  0x91   :  { %v233_v1 = vpop.permute.xlu1 %232 }
  0x93   :  { %v228_v0 = vpop.permute.xlu0 %227 }
  0x95   :  { %v243_v6 = vpop.permute.xlu1 %242 }
  0x97   :  { %v238_v2 = vpop.permute.xlu0 %237 }
  0x99   :  { %v329_v20 = vpop.permute.xlu1 %328 }
  0x9b   :  { %v324_v19 = vpop.permute.xlu0 %323 }
  0xdd   :  { %v463_v30 = vpop.f32.mrb[0].mxu0 }
  0xde   :  { %v183_v31 = vadd.f32 %v463_v30, %v68_v27  ;;  %v174_v32 = vpop.f32.mrb[1].mxu0  ;;  %v392_v30 = vpop.permute.xlu1 %391 }
  0xdf   :  { %v175_v34 = vadd.f32 %v174_v32, %v58_v26  ;;  %v464_v35 = vpop.f32.mrb[2].mxu0 }
  0xe0   :  { %v186_v36 = vadd.f32 %v464_v35, %v73_v29  ;;  %v177_v37 = vpop.f32.mrb[3].mxu0  ;;  %v207_v40 = vmax.f32 %v183_v31, 0.0  ;;  %v387_v29 = vpop.permute.xlu0 %386 }
  0xe1   :  { %v178_v39 = vadd.f32 %v177_v37, %v63_v28  ;;  %v205_v42 = vmax.f32 %v175_v34, 0.0 }
  0xe2   :  { %v208_v41 = vmax.f32 %v186_v36, 0.0 }
  0xe3   :  { %v206_v43 = vmax.f32 %v178_v39, 0.0 }
  0xe4   :  { %v218_v44 = vpack.c.bf16 %v208_v41, %v207_v40  ;;  %v407_v41 = vpop.permute.xlu0 %406 }
  0xe5   :  { %v467_v46 = vpop.f32.mrb[4].mxu0  ;;  %v217_v47 = vpack.c.bf16 %v206_v43, %v205_v42 }
  0xe6   :  { %v199_v48 = vadd.f32 %v467_v46, %v88_v45  ;;  %v190_v49 = vpop.f32.mrb[5].mxu0 }
  0xe7   :  { %v191_v51 = vadd.f32 %v190_v49, %v78_v33  ;;  %v468_v52 = vpop.f32.mrb[6].mxu0  ;;  %469 = vmatprep.subr.bf16.mxu1 %v217_v47  ;;  %v409_v33 = vlaneseq }
  0xe8   :  { %v202_v53 = vadd.f32 %v468_v52, %v93_v50  ;;  %v193_v54 = vpop.f32.mrb[7].mxu0  ;;  %470 = vmatpush3.bf16.msra.mxu1 %v217_v47  ;;  %v211_v56 = vmax.f32 %v199_v48, 0.0 }
  0xe9   :  { %v194_v55 = vadd.f32 %v193_v54, %v83_v38  ;;  %471 = vmatprep.subr.bf16.mxu1 %v218_v44  ;;  %v209_v58 = vmax.f32 %v191_v51, 0.0  ;;  %v410_v36 = vshrl.u32 %v409_v33, 7 }
  0xea   :  { %v212_v57 = vmax.f32 %v202_v53, 0.0 }
  0xeb   :  { %v210_v59 = vmax.f32 %v194_v55, 0.0  ;;  %v411_v39 = vsub.s32 0, %v410_v36 }
  0xec   :  { %v220_v60 = vpack.c.bf16 %v212_v57, %v211_v56  ;;  %472 = vmatpush3.bf16.msra.mxu1 %v218_v44 }
  0xed   :  { %v219_v61 = vpack.c.bf16 %v210_v59, %v209_v58  ;;  %v412_v43 = vrot.slane %v407_v41, %v411_v39 }
  0xef   :  { %473 = vmatprep.subr.bf16.mxu1 %v219_v61 }
  0xf0   :  { %474 = vmatpush3.bf16.msra.mxu1 %v219_v61 }
  0xf1   :  { %475 = vmatprep.subr.bf16.mxu1 %v220_v60 }
  0xf4   :  { %476 = vmatpush3.bf16.msra.mxu1 %v220_v60 }
  0xf7   :  { %478 = vmatmul.mubr.msk.bf16.vlgmr.msra.gmra.mrb[0].mxu1 %vm255_vm1, %v501_v62 }
 0x1ca   :  { %v479_v3 = vpop.f32.mrb[0].mxu1 }
 0x1cb   :  { %v305_v4 = vadd.f32 %v479_v3, %v238_v2  ;;  %v296_v5 = vpop.f32.mrb[1].mxu1 }
 0x1cc   :  { %v297_v7 = vadd.f32 %v296_v5, %v228_v0  ;;  %v480_v8 = vpop.f32.mrb[2].mxu1 }
 0x1cd   :  { %v308_v9 = vadd.f32 %v480_v8, %v243_v6  ;;  %v299_v10 = vpop.f32.mrb[3].mxu1  ;;  %v313_v12 = vmax.f32 %v305_v4, 0.0 }
 0x1ce   :  { %v300_v11 = vadd.f32 %v299_v10, %v233_v1  ;;  %v311_v14 = vmax.f32 %v297_v7, 0.0 }
 0x1cf   :  { %v314_v13 = vmax.f32 %v308_v9, 0.0 }
 0x1d0   :  { %v312_v15 = vmax.f32 %v300_v11, 0.0 }
 0x1d1   :  { %v318_v16 = vpack.c.bf16 %v314_v13, %v313_v12 }
 0x1d2   :  { %v317_v17 = vpack.c.bf16 %v312_v15, %v311_v14 }
 0x1d4   :  { %482 = vmatpush3.bf16.msra.mxu0 %v317_v17 }
 0x1d5   :  { %483 = vmatprep.subr.bf16.mxu0 %v508_v63 }
 0x1d8   :  { %484 = vmatpush3.bf16.msra.mxu0 %v318_v16 }
 0x1db   :  { %486 = vmatmul.mubr.msk.bf16.vlgmr.msra.gmra.mrb[8].mxu0 %vm127_vm0, %v502_v18 }
 0x2ae   :  { %v373_v21 = vpop.f32.mrb[8].mxu0 }
 0x2af   :  { %v374_v22 = vadd.f32 %v373_v21, %v324_v19  ;;  %v487_v23 = vpop.f32.mrb[9].mxu0 }
 0x2b0   :  { %v376_v24 = vpop.f32.mrb[10].mxu0 }
 0x2b1   :  { %v380_v25 = vmax.f32 %v374_v22, 0.0  ;;  %v377_v26 = vadd.f32 %v376_v24, %v329_v20  ;;  %v488_v27 = vpop.f32.mrb[11].mxu0 }
 0x2b3   :  { %v381_v28 = vmax.f32 %v377_v26, 0.0  ;;  %v394_v31 = vmul.f32 %v387_v29, %v380_v25 }
 0x2b5   :  { %v395_v32 = vmul.f32 %v392_v30, %v381_v28 }
 0x2b7   :  { %v396_v34 = vadd.f32 %v395_v32, %v394_v31 }
 0x2b9   :  { %v397_v35 = vrot.slane %v396_v34, 4 }
 0x2bb   :  { %v398_v37 = vadd.f32 %v397_v35, %v396_v34 }
 0x2bd   :  { %v399_v38 = vrot.slane %v398_v37, 2 }
 0x2bf   :  { %v400_v40 = vadd.f32 %v399_v38, %v398_v37 }
 0x2c1   :  { %v401_v42 = vrot.slane %v400_v40, 1 }
 0x2c3   :  { %v402_v44 = vadd.f32 %v401_v42, %v400_v40 }
 0x2c5   :  { %v413_v45 = vadd.f32 %v412_v43, %v402_v44 }
 0x2c7   :  { %v441_v46 = vmul.f32 -1.442695, %v413_v45 }
 0x2c9   :  { %503 = vpow2.f32 %v441_v46 }
 0x2d3   :  { %v504_v47 = vpop.eup %503 }
 0x2d4   :  { %v417_v48 = vadd.f32 1.0, %v504_v47 }
 0x2d6   :  { %505 = vrcp.f32 %v417_v48 }
 0x2e0   :  { %v506_v49 = vpop.eup %505 }
 0x2e1   :  { %420 = vst [vmem:[%s657_s9] sm:$0x1] %v506_v49 }

</bundles_post_ra>
